<compile_context>
chip_gen: v6e
topology: v6e:2x2x1
jax: 0.10.0
libtpu: 0.0.40
codegen_flags: <defaults>
</compile_context>

<pallas_src>
import functools

import jax
import jax.numpy as jnp
from jax.experimental import pallas as pl
from jax.experimental.pallas import tpu as pltpu

EPS = 1e-5


def _relu(h):
    return jnp.maximum(h, 0.0)


def _layernorm(h, gamma, beta):
    mean = jnp.mean(h, axis=-1, keepdims=True)
    var = jnp.mean((h - mean) ** 2, axis=-1, keepdims=True)
    return (h - mean) * jax.lax.rsqrt(var + EPS) * gamma + beta


def _scale_shift_from_stats(stats, gamma, beta, count):
    """BN affine from fused (sum, sumsq) stats.  stats: [B, C, 1] slices summed."""
    ssum, ssq = stats
    mean = ssum / count
    var = jnp.maximum(ssq / count - mean * mean, 0.0)
    scale = gamma * jax.lax.rsqrt(var + EPS)
    shift = beta - mean * scale
    return scale, shift


# ------------------------- pass 1: conv1 + bn1 stats -------------------------
def _stage1_kernel(x_ref, w1_ref, b1_ref, h1_ref, stats1_ref):
    t = pl.program_id(1)
    x = x_ref[0]                      # [3, TILE] f32
    w1 = w1_ref[...]                  # [64, 3]
    # K=3 contraction as broadcast FMAs (too small for the MXU).
    h = (w1[:, 0:1] * x[0:1, :]
         + w1[:, 1:2] * x[1:2, :]
         + w1[:, 2:3] * x[2:3, :]) + b1_ref[...]          # [64, TILE]
    h1_ref[0] = h

    @pl.when(t == 0)
    def _():
        stats1_ref[0] = jnp.zeros((64, 2), jnp.float32)

    stats1_ref[0, :, 0:1] += jnp.sum(h, axis=1, keepdims=True)
    stats1_ref[0, :, 1:2] += jnp.sum(h * h, axis=1, keepdims=True)


# ------------------- pass 2: bn1+relu, conv2 + bn2 stats ---------------------
def _stage2_kernel(h1_ref, stats1_ref, gb1_ref, w2_ref, b2_ref,
                   h2_ref, stats2_ref, *, count):
    t = pl.program_id(1)
    st = stats1_ref[...]                                    # [B, 64, 2]
    scale, shift = _scale_shift_from_stats(
        (jnp.sum(st[:, :, 0:1], axis=0), jnp.sum(st[:, :, 1:2], axis=0)),
        gb1_ref[:, 0:1], gb1_ref[:, 1:2], count)            # [64, 1]
    a = _relu(h1_ref[0] * scale + shift)                    # [64, TILE] f32
    h2 = jnp.dot(w2_ref[...], a.astype(jnp.bfloat16),
                 preferred_element_type=jnp.float32) + b2_ref[...]   # [128, TILE]
    h2_ref[0] = h2

    @pl.when(t == 0)
    def _():
        stats2_ref[0] = jnp.zeros((128, 2), jnp.float32)

    stats2_ref[0, :, 0:1] += jnp.sum(h2, axis=1, keepdims=True)
    stats2_ref[0, :, 1:2] += jnp.sum(h2 * h2, axis=1, keepdims=True)


# --------------- pass 3: bn2+relu, conv3 + bn3 stats + max/min ---------------
def _stage3_kernel(h2_ref, stats2_ref, gb2_ref, w3_ref, b3_ref,
                   stats3_ref, maxmin3_ref, *, count):
    t = pl.program_id(1)
    st = stats2_ref[...]                                    # [B, 128, 2]
    scale, shift = _scale_shift_from_stats(
        (jnp.sum(st[:, :, 0:1], axis=0), jnp.sum(st[:, :, 1:2], axis=0)),
        gb2_ref[:, 0:1], gb2_ref[:, 1:2], count)            # [128, 1]
    a = _relu(h2_ref[0] * scale + shift)                    # [128, TILE] f32
    h3 = jnp.dot(w3_ref[...], a.astype(jnp.bfloat16),
                 preferred_element_type=jnp.float32) + b3_ref[...]   # [1024, TILE]

    mx = jnp.max(h3, axis=1, keepdims=True)                 # [1024, 1]
    mn = jnp.min(h3, axis=1, keepdims=True)

    @pl.when(t == 0)
    def _():
        stats3_ref[0] = jnp.zeros((1024, 2), jnp.float32)
        maxmin3_ref[0, :, 0:1] = mx
        maxmin3_ref[0, :, 1:2] = mn

    @pl.when(t > 0)
    def _():
        maxmin3_ref[0, :, 0:1] = jnp.maximum(maxmin3_ref[0, :, 0:1], mx)
        maxmin3_ref[0, :, 1:2] = jnp.minimum(maxmin3_ref[0, :, 1:2], mn)

    stats3_ref[0, :, 0:1] += jnp.sum(h3, axis=1, keepdims=True)
    stats3_ref[0, :, 1:2] += jnp.sum(h3 * h3, axis=1, keepdims=True)


# ------------- head: bn3+relu+max finalize, fc1/ln4/fc2/ln5/fc3 --------------
def _head_kernel(stats3_ref, maxmin3_ref, gb3_ref,
                 fw1_ref, fb1_ref, lgb4_ref,
                 fw2_ref, fb2_ref, lgb5_ref,
                 fw3_ref, fb3_ref, out_ref, *, count):
    st = stats3_ref[...]                                    # [B, 1024, 2]
    mm = maxmin3_ref[...]                                   # [B, 1024, 2]
    ssum = jnp.sum(st[:, :, 0], axis=0, keepdims=True)      # [1, 1024]
    ssq = jnp.sum(st[:, :, 1], axis=0, keepdims=True)
    mean = ssum / count
    var = jnp.maximum(ssq / count - mean * mean, 0.0)
    gamma = gb3_ref[0:1, :]
    beta = gb3_ref[1:2, :]
    scale = gamma * jax.lax.rsqrt(var + EPS)                # [1, 1024]
    shift = beta - mean * scale
    mx = mm[:, :, 0]                                        # [B, 1024]
    mn = mm[:, :, 1]
    # max over points of relu(scale*h + shift), exact for either sign of scale.
    pooled = _relu(jnp.where(scale >= 0.0, scale * mx, scale * mn) + shift)

    f = jnp.dot(pooled.astype(jnp.bfloat16), fw1_ref[...],
                preferred_element_type=jnp.float32) + fb1_ref[...]   # [B, 512]
    f = _relu(_layernorm(f, lgb4_ref[0:1, :], lgb4_ref[1:2, :]))
    f = jnp.dot(f.astype(jnp.bfloat16), fw2_ref[...],
                preferred_element_type=jnp.float32) + fb2_ref[...]   # [B, 256]
    f = _relu(_layernorm(f, lgb5_ref[0:1, :], lgb5_ref[1:2, :]))
    out_ref[...] = jnp.dot(f, fw3_ref[...],
                           preferred_element_type=jnp.float32) + fb3_ref[...]  # [B, 9]


def _choose_tile(n):
    for t in (512, 256, 128):
        if n % t == 0:
            return t
    return n  # full-extent block (allowed even if not a multiple of 128)


def stn3d_forward(x, p, tile=None):
    """Mirrors STN3d.forward(x) for x of shape [B, 3, N]; returns [B, 3, 3]."""
    x = jnp.asarray(x, jnp.float32)
    B, C, N = x.shape
    assert C == 3, x.shape
    if tile is None:
        tile = _choose_tile(N)
    assert N % tile == 0
    T = N // tile
    count = float(B * N)
    grid = (B, T)
    cp = pltpu.CompilerParams(dimension_semantics=("parallel", "arbitrary"))

    const2 = lambda b, t: (0, 0)

    # ---- pass 1: conv1, bn1 stats ----
    h1, stats1 = pl.pallas_call(
        _stage1_kernel,
        grid=grid,
        in_specs=[
            pl.BlockSpec((1, 3, tile), lambda b, t: (b, 0, t)),
            pl.BlockSpec((64, 3), const2),
            pl.BlockSpec((64, 1), const2),
        ],
        out_specs=(
            pl.BlockSpec((1, 64, tile), lambda b, t: (b, 0, t)),
            pl.BlockSpec((1, 64, 2), lambda b, t: (b, 0, 0)),
        ),
        out_shape=(
            jax.ShapeDtypeStruct((B, 64, N), jnp.float32),
            jax.ShapeDtypeStruct((B, 64, 2), jnp.float32),
        ),
        compiler_params=cp,
    )(x, p["w1"], p["b1"])

    # ---- pass 2: bn1+relu, conv2, bn2 stats ----
    h2, stats2 = pl.pallas_call(
        functools.partial(_stage2_kernel, count=count),
        grid=grid,
        in_specs=[
            pl.BlockSpec((1, 64, tile), lambda b, t: (b, 0, t)),
            pl.BlockSpec((B, 64, 2), lambda b, t: (0, 0, 0)),
            pl.BlockSpec((64, 2), const2),
            pl.BlockSpec((128, 64), const2),
            pl.BlockSpec((128, 1), const2),
        ],
        out_specs=(
            pl.BlockSpec((1, 128, tile), lambda b, t: (b, 0, t)),
            pl.BlockSpec((1, 128, 2), lambda b, t: (b, 0, 0)),
        ),
        out_shape=(
            jax.ShapeDtypeStruct((B, 128, N), jnp.float32),
            jax.ShapeDtypeStruct((B, 128, 2), jnp.float32),
        ),
        compiler_params=cp,
    )(h1, stats1, p["gb1"], p["w2"], p["b2"])

    # ---- pass 3: bn2+relu, conv3, bn3 stats + per-batch max/min ----
    stats3, maxmin3 = pl.pallas_call(
        functools.partial(_stage3_kernel, count=count),
        grid=grid,
        in_specs=[
            pl.BlockSpec((1, 128, tile), lambda b, t: (b, 0, t)),
            pl.BlockSpec((B, 128, 2), lambda b, t: (0, 0, 0)),
            pl.BlockSpec((128, 2), const2),
            pl.BlockSpec((1024, 128), const2),
            pl.BlockSpec((1024, 1), const2),
        ],
        out_specs=(
            pl.BlockSpec((1, 1024, 2), lambda b, t: (b, 0, 0)),
            pl.BlockSpec((1, 1024, 2), lambda b, t: (b, 0, 0)),
        ),
        out_shape=(
            jax.ShapeDtypeStruct((B, 1024, 2), jnp.float32),
            jax.ShapeDtypeStruct((B, 1024, 2), jnp.float32),
        ),
        compiler_params=cp,
    )(h2, stats2, p["gb2"], p["w3"], p["b3"])

    # ---- tiny FC head (M = B), off the per-point hot path ----
    vmem = pl.BlockSpec(memory_space=pltpu.MemorySpace.VMEM)
    out9 = pl.pallas_call(
        functools.partial(_head_kernel, count=count),
        out_shape=jax.ShapeDtypeStruct((B, 9), jnp.float32),
        in_specs=[vmem] * 11,
        out_specs=vmem,
    )(stats3, maxmin3, p["gb3"], p["fw1"], p["fb1"], p["lgb4"],
      p["fw2"], p["fb2"], p["lgb5"], p["fw3"], p["fb3"])

    return out9.reshape(B, 3, 3)


def init_params(key):
    """Deterministic synthetic parameters.
    conv weights stored [Cout, Cin] (torch Conv1d layout, squeezed);
    fc weights stored [Cin, Cout] (torch Linear weight, transposed);
    big GEMM weights in bf16, everything else f32."""
    ks = iter(jax.random.split(key, 32))
    f32 = jnp.float32

    def mat(shape, fan_in):
        return jax.random.normal(next(ks), shape, f32) / jnp.sqrt(float(fan_in))

    def vec(shape, scale=0.05):
        return scale * jax.random.normal(next(ks), shape, f32)

    def gb(c, layout):
        g = 1.0 + 0.1 * jax.random.normal(next(ks), (c,), f32)
        b = 0.05 * jax.random.normal(next(ks), (c,), f32)
        if layout == "col":                 # (C, 2) for channel-major stages
            return jnp.stack([g, b], axis=1)
        return jnp.stack([g, b], axis=0)    # (2, C) for the FC head

    p = {}
    p["w1"] = mat((64, 3), 3)
    p["b1"] = vec((64, 1))
    p["gb1"] = gb(64, "col")
    p["w2"] = mat((128, 64), 64).astype(jnp.bfloat16)
    p["b2"] = vec((128, 1))
    p["gb2"] = gb(128, "col")
    p["w3"] = mat((1024, 128), 128).astype(jnp.bfloat16)
    p["b3"] = vec((1024, 1))
    p["gb3"] = gb(1024, "row")
    p["fw1"] = mat((1024, 512), 1024).astype(jnp.bfloat16)
    p["fb1"] = vec((1, 512))
    p["lgb4"] = gb(512, "row")
    p["fw2"] = mat((512, 256), 512).astype(jnp.bfloat16)
    p["fb2"] = vec((1, 256))
    p["lgb5"] = gb(256, "row")
    p["fw3"] = mat((256, 9), 256)
    p["fb3"] = vec((1, 9))
    return p


def _reference(x, p):
    """Pure-JAX f32 reference with identical train-mode BN semantics
    (bf16 weights upcast, so the only delta vs the kernel is matmul precision)."""
    def bn_train(h, gamma, beta):           # h: [B, C, N], stats over (B, N)
        mean = jnp.mean(h, axis=(0, 2), keepdims=True)
        var = jnp.mean((h - mean) ** 2, axis=(0, 2), keepdims=True)
        return (h - mean) * jax.lax.rsqrt(var + EPS) * gamma + beta

    def conv(h, w, b):                      # w: [Cout, Cin], b: [Cout, 1]
        return jnp.einsum("oc,bcn->bon", w.astype(jnp.float32), h) + b

    h = jax.nn.relu(bn_train(conv(x, p["w1"], p["b1"]),
                             p["gb1"][:, 0][None, :, None], p["gb1"][:, 1][None, :, None]))
    h = jax.nn.relu(bn_train(conv(h, p["w2"], p["b2"]),
                             p["gb2"][:, 0][None, :, None], p["gb2"][:, 1][None, :, None]))
    h = jax.nn.relu(bn_train(conv(h, p["w3"], p["b3"]),
                             p["gb3"][0][None, :, None], p["gb3"][1][None, :, None]))
    g = jnp.max(h, axis=2)                  # [B, 1024]

    def ln(h, gamma, beta):
        mean = jnp.mean(h, axis=-1, keepdims=True)
        var = jnp.mean((h - mean) ** 2, axis=-1, keepdims=True)
        return (h - mean) * jax.lax.rsqrt(var + EPS) * gamma + beta

    f = jax.nn.relu(ln(g @ p["fw1"].astype(jnp.float32) + p["fb1"],
                       p["lgb4"][0:1], p["lgb4"][1:2]))
    f = jax.nn.relu(ln(f @ p["fw2"].astype(jnp.float32) + p["fb2"],
                       p["lgb5"][0:1], p["lgb5"][1:2]))
    out = f @ p["fw3"] + p["fb3"]
    return out.reshape(-1, 3, 3)


if __name__ == "__main__":
    key = jax.random.PRNGKey(0)
    k_params, k_x = jax.random.split(key)

    params = init_params(k_params)

    B, N = 2, 1024                           # x: [B, 3, N], torch STN3d input layout
    x = jax.random.normal(k_x, (B, 3, N), jnp.float32)

    trans = stn3d_forward(x, params)
    jax.block_until_ready(trans)

    assert trans.shape == (B, 3, 3), trans.shape
    assert bool(jnp.all(jnp.isfinite(trans)))

    ref = _reference(x, params)
    assert bool(jnp.allclose(trans, ref, atol=0.1, rtol=0.1)), (trans, ref)

    print("KERNEL_OK")
</pallas_src>

<mosaic_0001>
module attributes {stable_mosaic.version = 11 : i64} {
  func.func @_stage1_kernel(%arg0: i32, %arg1: i32, %arg2: memref<1x3x512xf32, #tpu.memory_space<vmem>>, %arg3: memref<64x3xf32, #tpu.memory_space<vmem>>, %arg4: memref<64x1xf32, #tpu.memory_space<vmem>>, %arg5: memref<1x64x512xf32, #tpu.memory_space<vmem>>, %arg6: memref<1x64x2xf32, #tpu.memory_space<vmem>>) attributes {dimension_semantics = [#tpu.dimension_semantics<parallel>, #tpu.dimension_semantics<arbitrary>], iteration_bounds = array<i64: 2, 2>, scalar_prefetch = 0 : i64, scratch_operands = 0 : i64, tpu.core_type = #tpu.core_type<tc>, window_params = [{transform_indices = @transform_0, window_bounds = array<i64: 1, 3, 512>}, {pipeline_mode = #tpu.pipeline_mode<synchronous>, transform_indices = @transform_1, window_bounds = array<i64: 64, 3>}, {pipeline_mode = #tpu.pipeline_mode<synchronous>, transform_indices = @transform_2, window_bounds = array<i64: 64, 1>}, {transform_indices = @transform_3, window_bounds = array<i64: 1, 64, 512>}, {transform_indices = @transform_4, window_bounds = array<i64: 1, 64, 2>}]} {
    %c0 = arith.constant 0 : index
    %c0_0 = arith.constant 0 : index
    %c0_1 = arith.constant 0 : index
    %0 = vector.load %arg2[%c0, %c0_0, %c0_1] : memref<1x3x512xf32, #tpu.memory_space<vmem>>, vector<1x3x512xf32>
    %1 = vector.shape_cast %0 : vector<1x3x512xf32> to vector<3x512xf32>
    %c0_2 = arith.constant 0 : index
    %c0_3 = arith.constant 0 : index
    %2 = vector.load %arg3[%c0_2, %c0_3] : memref<64x3xf32, #tpu.memory_space<vmem>>, vector<64x3xf32>
    %3 = vector.extract_strided_slice %2 {offsets = [0, 0], sizes = [64, 1], strides = [1, 1]} : vector<64x3xf32> to vector<64x1xf32>
    %4 = vector.extract_strided_slice %1 {offsets = [0, 0], sizes = [1, 512], strides = [1, 1]} : vector<3x512xf32> to vector<1x512xf32>
    %5 = vector.broadcast %3 : vector<64x1xf32> to vector<64x512xf32>
    %6 = vector.broadcast %4 : vector<1x512xf32> to vector<64x512xf32>
    %7 = arith.mulf %5, %6 : vector<64x512xf32>
    %8 = vector.extract_strided_slice %2 {offsets = [0, 1], sizes = [64, 1], strides = [1, 1]} : vector<64x3xf32> to vector<64x1xf32>
    %9 = vector.extract_strided_slice %1 {offsets = [1, 0], sizes = [1, 512], strides = [1, 1]} : vector<3x512xf32> to vector<1x512xf32>
    %10 = vector.broadcast %8 : vector<64x1xf32> to vector<64x512xf32>
    %11 = vector.broadcast %9 : vector<1x512xf32> to vector<64x512xf32>
    %12 = arith.mulf %10, %11 : vector<64x512xf32>
    %13 = arith.addf %7, %12 : vector<64x512xf32>
    %14 = vector.extract_strided_slice %2 {offsets = [0, 2], sizes = [64, 1], strides = [1, 1]} : vector<64x3xf32> to vector<64x1xf32>
    %15 = vector.extract_strided_slice %1 {offsets = [2, 0], sizes = [1, 512], strides = [1, 1]} : vector<3x512xf32> to vector<1x512xf32>
    %16 = vector.broadcast %14 : vector<64x1xf32> to vector<64x512xf32>
    %17 = vector.broadcast %15 : vector<1x512xf32> to vector<64x512xf32>
    %18 = arith.mulf %16, %17 : vector<64x512xf32>
    %19 = arith.addf %13, %18 : vector<64x512xf32>
    %c0_4 = arith.constant 0 : index
    %c0_5 = arith.constant 0 : index
    %20 = vector.load %arg4[%c0_4, %c0_5] : memref<64x1xf32, #tpu.memory_space<vmem>>, vector<64x1xf32>
    %21 = vector.broadcast %20 : vector<64x1xf32> to vector<64x512xf32>
    %22 = arith.addf %19, %21 : vector<64x512xf32>
    %c0_6 = arith.constant 0 : index
    %c0_7 = arith.constant 0 : index
    %c0_8 = arith.constant 0 : index
    %23 = vector.load %arg5[%c0_6, %c0_7, %c0_8] : memref<1x64x512xf32, #tpu.memory_space<vmem>>, vector<1x64x512xf32>
    %24 = vector.shape_cast %23 : vector<1x64x512xf32> to vector<64x512xf32>
    %25 = vector.shape_cast %22 : vector<64x512xf32> to vector<1x64x512xf32>
    tpu.vector_store %arg5[%c0_6, %c0_7, %c0_8], %25 {strides = array<i32>} : memref<1x64x512xf32, #tpu.memory_space<vmem>>, vector<1x64x512xf32>,
    %c0_i32 = arith.constant 0 : i32
    %26 = arith.cmpi eq, %arg1, %c0_i32 : i32
    %27 = arith.extui %26 : i1 to i32
    %c0_i32_9 = arith.constant 0 : i32
    %28 = arith.cmpi ne, %27, %c0_i32_9 : i32
    scf.if %28 {
      %cst_22 = arith.constant 0.000000e+00 : f32
      %46 = vector.broadcast %cst_22 : f32 to vector<64x2xf32>
      %c0_23 = arith.constant 0 : index
      %c0_24 = arith.constant 0 : index
      %c0_25 = arith.constant 0 : index
      %47 = vector.load %arg6[%c0_23, %c0_24, %c0_25] : memref<1x64x2xf32, #tpu.memory_space<vmem>>, vector<1x64x2xf32>
      %48 = vector.shape_cast %47 : vector<1x64x2xf32> to vector<64x2xf32>
      %49 = vector.shape_cast %46 : vector<64x2xf32> to vector<1x64x2xf32>
      tpu.vector_store %arg6[%c0_23, %c0_24, %c0_25], %49 {strides = array<i32>} : memref<1x64x2xf32, #tpu.memory_space<vmem>>, vector<1x64x2xf32>,
    } else {
    }
    %c0_10 = arith.constant 0 : index
    %c0_11 = arith.constant 0 : index
    %c0_12 = arith.constant 0 : index
    %29 = vector.load %arg6[%c0_10, %c0_11, %c0_12] : memref<1x64x2xf32, #tpu.memory_space<vmem>>, vector<1x64x1xf32>
    %30 = vector.shape_cast %29 : vector<1x64x1xf32> to vector<64x1xf32>
    %cst = arith.constant dense<0.000000e+00> : vector<64xf32>
    %31 = vector.multi_reduction <add>, %22, %cst [1] : vector<64x512xf32> to vector<64xf32>
    %32 = vector.shape_cast %31 : vector<64xf32> to vector<64x1xf32>
    %33 = arith.addf %30, %32 : vector<64x1xf32>
    %c0_13 = arith.constant 0 : index
    %c0_14 = arith.constant 0 : index
    %c0_15 = arith.constant 0 : index
    %34 = vector.load %arg6[%c0_13, %c0_14, %c0_15] : memref<1x64x2xf32, #tpu.memory_space<vmem>>, vector<1x64x1xf32>
    %35 = vector.shape_cast %34 : vector<1x64x1xf32> to vector<64x1xf32>
    %36 = vector.shape_cast %33 : vector<64x1xf32> to vector<1x64x1xf32>
    tpu.vector_store %arg6[%c0_13, %c0_14, %c0_15], %36 {strides = array<i32>} : memref<1x64x2xf32, #tpu.memory_space<vmem>>, vector<1x64x1xf32>,
    %c0_16 = arith.constant 0 : index
    %c0_17 = arith.constant 0 : index
    %c1 = arith.constant 1 : index
    %37 = vector.load %arg6[%c0_16, %c0_17, %c1] : memref<1x64x2xf32, #tpu.memory_space<vmem>>, vector<1x64x1xf32>
    %38 = vector.shape_cast %37 : vector<1x64x1xf32> to vector<64x1xf32>
    %39 = arith.mulf %22, %22 : vector<64x512xf32>
    %cst_18 = arith.constant dense<0.000000e+00> : vector<64xf32>
    %40 = vector.multi_reduction <add>, %39, %cst_18 [1] : vector<64x512xf32> to vector<64xf32>
    %41 = vector.shape_cast %40 : vector<64xf32> to vector<64x1xf32>
    %42 = arith.addf %38, %41 : vector<64x1xf32>
    %c0_19 = arith.constant 0 : index
    %c0_20 = arith.constant 0 : index
    %c1_21 = arith.constant 1 : index
    %43 = vector.load %arg6[%c0_19, %c0_20, %c1_21] : memref<1x64x2xf32, #tpu.memory_space<vmem>>, vector<1x64x1xf32>
    %44 = vector.shape_cast %43 : vector<1x64x1xf32> to vector<64x1xf32>
    %45 = vector.shape_cast %42 : vector<64x1xf32> to vector<1x64x1xf32>
    tpu.vector_store %arg6[%c0_19, %c0_20, %c1_21], %45 {strides = array<i32>} : memref<1x64x2xf32, #tpu.memory_space<vmem>>, vector<1x64x1xf32>,
    return
  }
  func.func @transform_0(%arg0: i32, %arg1: i32) -> (i32, i32, i32) {
    %c0_i32 = arith.constant 0 : i32
    %c0_i32_0 = arith.constant 0 : i32
    return %arg0, %c0_i32, %arg1 : i32, i32, i32
  }
  func.func @transform_1(%arg0: i32, %arg1: i32) -> (i32, i32) {
    %c0_i32 = arith.constant 0 : i32
    %c0_i32_0 = arith.constant 0 : i32
    %c0_i32_1 = arith.constant 0 : i32
    return %c0_i32, %c0_i32_0 : i32, i32
  }
  func.func @transform_2(%arg0: i32, %arg1: i32) -> (i32, i32) {
    %c0_i32 = arith.constant 0 : i32
    %c0_i32_0 = arith.constant 0 : i32
    %c0_i32_1 = arith.constant 0 : i32
    return %c0_i32, %c0_i32_0 : i32, i32
  }
  func.func @transform_3(%arg0: i32, %arg1: i32) -> (i32, i32, i32) {
    %c0_i32 = arith.constant 0 : i32
    %c0_i32_0 = arith.constant 0 : i32
    return %arg0, %c0_i32, %arg1 : i32, i32, i32
  }
  func.func @transform_4(%arg0: i32, %arg1: i32) -> (i32, i32, i32) {
    %c0_i32 = arith.constant 0 : i32
    %c0_i32_0 = arith.constant 0 : i32
    %c0_i32_1 = arith.constant 0 : i32
    return %arg0, %c0_i32, %c0_i32_0 : i32, i32, i32
  }
}

</mosaic_0001>

<bundles_post_ra>
// kernel: tpu_custom_call.1
= control target key start
LH: loop header
LB: loop body
LE: loop exit
PB: predicated region body
PF: predicated region fallthrough
CT: control target
= control target key end

     0   :  { %10 = vsyncpa [#allocation3], 0  ;;  %s2024_s0 = inlined_call_operand.vmem [shape: f32[2,3,1024], index: 0, kind: input, shape index: {}]   ;;  %s2025_s1 = inlined_call_operand.vmem [shape: f32[64,3], index: 1, kind: input, shape index: {}]   ;;  %s2026_s2 = inlined_call_operand.vmem [shape: f32[64,1], index: 2, kind: input, shape index: {}]   ;;  %s2027_s3 = inlined_call_operand.hbm [shape: f32[2,64,1024], index: 3, kind: output, shape index: {0}]   ;;  %s2028_s4 = inlined_call_operand.vmem [shape: f32[2,64,2], index: 4, kind: output, shape index: {1}]  }
   0x1   :  { %12 = vsyncpa [#allocation3 + $0x1], 0  ;;  %s1273_s15 = smov 0   ;;  %s1275_s16 = smov 0  }
   0x2   :  { %s1277_s17 = smov 0   ;;  %s1279_s18 = smov 0  }
   0x3   :  { %s1281_s19 = smov 0   ;;  %s1283_s20 = smov 0  }
   0x4   :  { %s1285_s21 = smov 0   ;;  %s1287_s22 = smov 0  }
   0x5 LB: > { %s1042_s23 = sadd.s32 4294967295, %s1238_s22   ;;  %s1043_s24 = sadd.s32 4294967294, %s1238_s22   ;;  %s1238_s22 = sphi %s1287_s22, %s18_s22   ;;  %s1234_s21 = sphi %s1285_s21, %s2070_s21   ;;  %s1230_s20 = sphi %s1283_s20, %s2069_s20   ;;  %s1226_s19 = sphi %s1281_s19, %s2068_s19   ;;  %s1222_s18 = sphi %s1279_s18, %s2067_s18   ;;  %s1218_s17 = sphi %s1277_s17, %s2066_s17   ;;  %s1214_s16 = sphi %s1275_s16, %s2065_s16   ;;  %s1210_s15 = sphi %s1273_s15, %s2064_s15  }
   0x6   : > { %s27_s25 = sadd.s32 1, %s1230_s20  ;;  %s30_s26 = sadd.s32 1, %s1234_s21 }
   0x7   : > { %p28_p0 = scmp.ge.s32.totalorder %s27_s25, 2  ;;  %p119_p1 = scmp.ne.s32.totalorder %s1218_s17, %s1214_s16 }
   0x8   : > { %p120_p2 = scmp.eq.s32.totalorder %s1042_s23, 3  ;;  %p125_p5 = scmp.ne.s32.totalorder %s1214_s16, %s1210_s15 }
   0x9   : > { %s2072_s25 = smov (%p28_p0, %s27_s25), 0  ;;  %s2074_s26 = smov (!%p28_p0, %s30_s26), %s1234_s21 }
   0xa   : > { %s105_s27 = ssub.s32 %s1230_s20, %s2072_s25  ;;  %p1324_p3 = por %p120_p2, %p119_p1 }
   0xb   : > { %p32_p4 = scmp.ge.s32.totalorder %s2074_s26, 2  ;;  %p126_p6 = scmp.eq.s32.totalorder %s1043_s24, 3 }
   0xc   : > { %p1046_p7 = scmp.ge.s32.totalorder %s1238_s22, 1  ;;  %p189_p9 = scmp.lt.s32.totalorder %s1238_s22, 5 }
   0xd   : > { %s2076_s26 = smov (%p32_p4, %s2074_s26), 0  ;;  %p1333_p8 = por %p126_p6, %p125_p5 }
   0xe   : > { %s104_s30 = ssub.s32 %s1234_s21, %s2076_s26  ;;  %s109_s5 = sadd.s32 1, %s1218_s17 }
   0xf   : > { %s106_s6 = sor.u32 %s105_s27, %s104_s30  ;;  %p190_p10 = pnand %p1046_p7, %p189_p9 }
  0x10   : > { %p107_p11 = scmp.eq.s32.totalorder %s106_s6, 0 }
  0x11   : > { %193 = sbr.rel (%p190_p10) target bundleno = 399 (0x18f), region = 32 }
  0x12   : > { %s1342_s7 = scalar_select %p107_p11, %s1218_s17, %s109_s5  }
  0x16   : > { %v244_v0 = vld [vmem:[%s2025_s1 + $0x10] sm:$0xff]  ;;  %v242_v1 = vld [vmem:[%s2025_s1] sm:$0xff]  ;;  %v1240_v2 = vmov 1   ;;  %v1241_v3 = vmov 0   ;;  %v245_v4 = vld [vmem:[%s2025_s1 + $0x18] sm:$0xff]  ;;  %p225_p12 = scmp.lt.s32.totalorder %s1226_s19, 1  ;;  %v292_v19 = vlaneseq }
  0x17   : > { %1140 = vset.pattern.permute.xlu0 %v1240_v2  ;;  %1139 = vset.pattern.permute.xlu1 %v1241_v3  ;;  %v247_v5 = vld [vmem:[%s2025_s1 + $0x28] sm:$0xff]  ;;  %v249_v6 = vld [vmem:[%s2025_s1 + $0x38] sm:$0xff]  ;;  %v1242_v8 = vmov 2   ;;  %v246_v9 = vld [vmem:[%s2025_s1 + $0x20] sm:$0xff]  ;;  %s1403_s10 = sshll.u32 %s1222_s18, 2  ;;  %p1053_p0 = scmp.ne.s32.totalorder %s1222_s18, 0 }
  0x18   : > { %262 = vperm.xlu1 %1139, %v244_v0   ;;  %361 = vperm.xlu0 %1140, %v242_v1   ;;  %s1358_s24 = scalar_select %p225_p12, %s1226_s19, 1  ;;  %v243_v7 = vld [vmem:[%s2025_s1 + $0x8] sm:$0xff]  ;;  %v248_v10 = vld [vmem:[%s2025_s1 + $0x30] sm:$0xff]  ;;  %v624_v11 = vld [vmem:[%s2026_s2] sm:$0xff]  ;;  %v293_v22 = vshrl.u32 %v292_v19, 7 }
  0x19   : > { %v627_v12 = vld [vmem:[%s2026_s2 + $0x18] sm:$0xff]  ;;  %v629_v13 = vld [vmem:[%s2026_s2 + $0x28] sm:$0xff]  ;;  %v626_v16 = vld [vmem:[%s2026_s2 + $0x10] sm:$0xff]  ;;  %p227_p13 = scmp.lt.s32.totalorder %s1403_s10, 7 }
  0x1a   : > { %s1060_s27 = sshll.u32 %s1358_s24, 6  ;;  %v625_v14 = vld [vmem:[%s2026_s2 + $0x8] sm:$0xff]  ;;  %v631_v15 = vld [vmem:[%s2026_s2 + $0x38] sm:$0xff]  ;;  %v628_v17 = vld [vmem:[%s2026_s2 + $0x20] sm:$0xff]  ;;  %s1049_s12 = sshll.u32 %s1358_s24, 3  ;;  %v294_v25 = vsub.s32 0, %v293_v22 }
  0x1b   : > { %s1367_s9 = scalar_lea.vmem %s2028_s4, %s1060_s27  ;;  %v630_v18 = vld [vmem:[%s2026_s2 + $0x30] sm:$0xff]  ;;  %v298_v26 = vsub.s32 4, %v293_v22  ;;  %v394_v31 = vsub.s32 1, %v293_v22  ;;  %v398_v32 = vsub.s32 5, %v293_v22  ;;  %v526_v33 = vsub.s32 2, %v293_v22  ;;  %s214_s24 = sand.u32 1, %s1214_s16  }
  0x1c   : > { %267 = vperm.xlu1 %1139, %v245_v4   ;;  %373 = vperm.xlu0 %1140, %v245_v4   ;;  %s228_s11 = scalar_select %p227_p13, %s1403_s10, 7  ;;  %v530_v34 = vsub.s32 6, %v293_v22 }
  0x1d   : > { %s1047_s5 = sshll.u32 %s214_s24, 8 }
  0x1e   : > { %s230_s13 = sadd.s32 %s1049_s12, %s228_s11  ;;  %s1638_s6 = scalar_lea.vmem [#allocation2], %s1047_s5 }
  0x1f   : > { %s1050_s14 = sshll.u32 %s230_s13, 2 }
  0x20   : > { %277 = vperm.xlu1 %1139, %v247_v5   ;;  %381 = vperm.xlu0 %1140, %v247_v5   ;;  %s232_s30 = scalar_lea.vmem %s2024_s0, %s1050_s14 }
  0x21   : > { %v240_v27 = vld [vmem:[%s232_s30] sm:$0x77]  ;;  %v241_v28 = vld [vmem:[%s232_s30 + $0x8] sm:$0x77] }
  0x22   : > { %v295_v35 = vrot.slane %v240_v27, %v294_v25  ;;  %v299_v36 = vrot.slane %v240_v27, %v298_v26  ;;  %v303_v37 = vrot.slane %v241_v28, %v294_v25  ;;  %v307_v38 = vrot.slane %v241_v28, %v298_v26 }
  0x23   : > { %v395_v40 = vrot.slane %v240_v27, %v394_v31  ;;  %v399_v41 = vrot.slane %v240_v27, %v398_v32  ;;  %v403_v42 = vrot.slane %v241_v28, %v394_v31  ;;  %v407_v43 = vrot.slane %v241_v28, %v398_v32 }
  0x24   : > { %287 = vperm.xlu1 %1139, %v249_v6   ;;  %389 = vperm.xlu0 %1140, %v249_v6   ;;  %v527_v45 = vrot.slane %v240_v27, %v526_v33  ;;  %v531_v46 = vrot.slane %v240_v27, %v530_v34  ;;  %v535_v47 = vrot.slane %v241_v28, %v526_v33 }
  0x25   : > { %v539_v48 = vrot.slane %v241_v28, %v530_v34  ;;  %v1413_v49 = vrot.slane %v295_v35, %v294_v25  ;;  %v1415_v50 = vrot.slane %v299_v36, %v294_v25  ;;  %v1417_v51 = vrot.slane %v303_v37, %v294_v25 }
  0x26   : > { %v1419_v52 = vrot.slane %v307_v38, %v294_v25  ;;  %v1421_v53 = vrot.slane %v395_v40, %v394_v31  ;;  %v1423_v54 = vrot.slane %v399_v41, %v394_v31  ;;  %v1425_v55 = vrot.slane %v403_v42, %v394_v31 }
  0x27   : > { %v1427_v56 = vrot.slane %v407_v43, %v394_v31  ;;  %v1433_v59 = vrot.slane %v527_v45, %v526_v33  ;;  %v1435_v60 = vrot.slane %v531_v46, %v526_v33  ;;  %v1437_v61 = vrot.slane %v535_v47, %v526_v33 }
  0x28   : > { %1141 = vset.pattern.permute.xlu1 %v1240_v2  ;;  %1143 = vset.pattern.permute.xlu0 %v1242_v8  ;;  %v1439_v62 = vrot.slane %v539_v48, %v526_v33 }
  0x29   : > { %365 = vperm.xlu1 %1141, %v243_v7   ;;  %497 = vperm.xlu0 %1143, %v243_v7  }
  0x2d   : > { %369 = vperm.xlu1 %1141, %v244_v0   ;;  %509 = vperm.xlu0 %1143, %v246_v9  }
  0x31   : > { %377 = vperm.xlu1 %1141, %v246_v9   ;;  %517 = vperm.xlu0 %1143, %v248_v10  }
  0x35   : > { %385 = vperm.xlu1 %1141, %v248_v10   ;;  %1144 = vset.pattern.permute.xlu0 %v1241_v3 }
  0x36   : > { %252 = vperm.xlu0 %1144, %v242_v1  }
  0x39   : > { %1142 = vset.pattern.permute.xlu1 %v1242_v8 }
  0x3a   : > { %493 = vperm.xlu1 %1142, %v242_v1   ;;  %257 = vperm.xlu0 %1144, %v243_v7  }
  0x3e   : > { %501 = vperm.xlu1 %1142, %v244_v0   ;;  %272 = vperm.xlu0 %1144, %v246_v9  }
  0x42   : > { %505 = vperm.xlu1 %1142, %v245_v4   ;;  %282 = vperm.xlu0 %1144, %v248_v10  }
  0x46   : > { %513 = vperm.xlu1 %1142, %v247_v5   ;;  %634 = vperm.xlu0 %1144, %v624_v11  }
  0x4a   : > { %521 = vperm.xlu1 %1142, %v249_v6   ;;  %649 = vperm.xlu0 %1144, %v627_v12  }
  0x4e   : > { %1145 = vset.pattern.permute.xlu1 %v1241_v3  ;;  %659 = vperm.xlu0 %1144, %v629_v13  }
  0x4f   : > { %639 = vperm.xlu1 %1145, %v625_v14  }
  0x52   : > { %669 = vperm.xlu0 %1144, %v631_v15  }
  0x53   : > { %644 = vperm.xlu1 %1145, %v626_v16  }
  0x57   : > { %654 = vperm.xlu1 %1145, %v628_v17  }
  0x5b   : > { %664 = vperm.xlu1 %1145, %v630_v18  }
  0x93   : > { %v263_v20 = vpop.permute.xlu1 %262  ;;  %v1408_v21 = vpop.permute.xlu0 %361 }
  0x94   : > { %v1442_v63 = vmul.f32 %v1413_v49, %v263_v20  ;;  %v1445_v0 = vmul.f32 %v1415_v50, %v263_v20  ;;  %v1448_v1 = vmul.f32 %v1417_v51, %v263_v20  ;;  %v1451_v2 = vmul.f32 %v1419_v52, %v263_v20 }
  0x95   : > { %v429_v33 = vmul.f32 %v1423_v54, %v1408_v21  ;;  %v430_v34 = vmul.f32 %v1425_v55, %v1408_v21  ;;  %v431_v35 = vmul.f32 %v1427_v56, %v1408_v21 }
  0x97   : > { %v268_v23 = vpop.permute.xlu1 %267  ;;  %v374_v24 = vpop.permute.xlu0 %373 }
  0x98   : > { %v340_v3 = vmul.f32 %v1413_v49, %v268_v23  ;;  %v341_v4 = vmul.f32 %v1415_v50, %v268_v23  ;;  %v342_v5 = vmul.f32 %v1417_v51, %v268_v23  ;;  %v343_v6 = vmul.f32 %v1419_v52, %v268_v23 }
  0x99   : > { %v440_v7 = vmul.f32 %v1421_v53, %v374_v24  ;;  %v441_v8 = vmul.f32 %v1423_v54, %v374_v24  ;;  %v442_v9 = vmul.f32 %v1425_v55, %v374_v24  ;;  %v443_v10 = vmul.f32 %v1427_v56, %v374_v24 }
  0x9b   : > { %v278_v29 = vpop.permute.xlu1 %277  ;;  %v382_v30 = vpop.permute.xlu0 %381  ;;  %v1487_v36 = vadd.f32 %v440_v7, %v340_v3  ;;  %v1489_v37 = vadd.f32 %v441_v8, %v341_v4  ;;  %v1491_v38 = vadd.f32 %v442_v9, %v342_v5 }
  0x9c   : > { %v348_v13 = vmul.f32 %v1413_v49, %v278_v29  ;;  %v349_v14 = vmul.f32 %v1415_v50, %v278_v29  ;;  %v350_v15 = vmul.f32 %v1417_v51, %v278_v29  ;;  %v351_v16 = vmul.f32 %v1419_v52, %v278_v29 }
  0x9d   : > { %v448_v17 = vmul.f32 %v1421_v53, %v382_v30  ;;  %v449_v18 = vmul.f32 %v1423_v54, %v382_v30  ;;  %v450_v19 = vmul.f32 %v1425_v55, %v382_v30  ;;  %v451_v20 = vmul.f32 %v1427_v56, %v382_v30 }
  0x9e   : > { %v428_v30 = vmul.f32 %v1421_v53, %v1408_v21 }
  0x9f   : > { %v288_v39 = vpop.permute.xlu1 %287  ;;  %v390_v44 = vpop.permute.xlu0 %389  ;;  %v1495_v40 = vadd.f32 %v448_v17, %v348_v13  ;;  %v1497_v41 = vadd.f32 %v449_v18, %v349_v14  ;;  %v1499_v42 = vadd.f32 %v450_v19, %v350_v15  ;;  %v1501_v43 = vadd.f32 %v451_v20, %v351_v16 }
  0xa0   : > { %v356_v22 = vmul.f32 %v1413_v49, %v288_v39  ;;  %v357_v23 = vmul.f32 %v1415_v50, %v288_v39  ;;  %v358_v24 = vmul.f32 %v1417_v51, %v288_v39  ;;  %v359_v25 = vmul.f32 %v1419_v52, %v288_v39 }
  0xa1   : > { %v456_v26 = vmul.f32 %v1421_v53, %v390_v44  ;;  %v457_v27 = vmul.f32 %v1423_v54, %v390_v44  ;;  %v458_v28 = vmul.f32 %v1425_v55, %v390_v44  ;;  %v459_v29 = vmul.f32 %v1427_v56, %v390_v44 }
  0xa2   : > { %v1493_v39 = vadd.f32 %v443_v10, %v343_v6 }
  0xa3   : > { %v1503_v45 = vadd.f32 %v456_v26, %v356_v22  ;;  %v1505_v21 = vadd.f32 %v457_v27, %v357_v23  ;;  %v1507_v46 = vadd.f32 %v458_v28, %v358_v24  ;;  %v1509_v47 = vadd.f32 %v459_v29, %v359_v25 }
  0xa4   : > { %v1429_v57 = vpop.permute.xlu1 %365  ;;  %v1431_v58 = vpop.permute.xlu0 %497 }
  0xa5   : > { %2033 = vst [vmem:[#allocation6_spill] sm:$0xff] %v1503_v45  ;;  %2034 = vst [vmem:[#allocation7_spill] sm:$0xff] %v1505_v21  ;;  %v432_v7 = vmul.f32 %v1421_v53, %v1429_v57  ;;  %v433_v8 = vmul.f32 %v1423_v54, %v1429_v57  ;;  %v434_v9 = vmul.f32 %v1425_v55, %v1429_v57 }
  0xa6   : > { %2035 = vst [vmem:[#allocation8_spill] sm:$0xff] %v1507_v46  ;;  %2036 = vst [vmem:[#allocation9_spill] sm:$0xff] %v1509_v47  ;;  %v435_v10 = vmul.f32 %v1427_v56, %v1429_v57  ;;  %v564_v13 = vmul.f32 %v1433_v59, %v1431_v58  ;;  %v565_v14 = vmul.f32 %v1435_v60, %v1431_v58 }
  0xa7   : > { %v567_v15 = vmul.f32 %v1439_v62, %v1431_v58 }
  0xa8   : > { %v370_v11 = vpop.permute.xlu1 %369  ;;  %v510_v12 = vpop.permute.xlu0 %509 }
  0xa9   : > { %v436_v48 = vmul.f32 %v1421_v53, %v370_v11  ;;  %v437_v3 = vmul.f32 %v1423_v54, %v370_v11  ;;  %v438_v4 = vmul.f32 %v1425_v55, %v370_v11  ;;  %v439_v5 = vmul.f32 %v1427_v56, %v370_v11 }
  0xaa   : > { %v566_v11 = vmul.f32 %v1437_v61, %v1431_v58  ;;  %v1532_v16 = vmul.f32 %v1433_v59, %v510_v12  ;;  %v1535_v17 = vmul.f32 %v1435_v60, %v510_v12  ;;  %v1538_v57 = vmul.f32 %v1437_v61, %v510_v12 }
  0xab   : > { %v1541_v18 = vmul.f32 %v1439_v62, %v510_v12  ;;  %v1544_v19 = vadd.f32 %v436_v48, %v1442_v63  ;;  %v1547_v20 = vadd.f32 %v437_v3, %v1445_v0  ;;  %v1550_v58 = vadd.f32 %v438_v4, %v1448_v1 }
  0xac   : > { %v378_v31 = vpop.permute.xlu1 %377  ;;  %v1477_v32 = vpop.permute.xlu0 %517  ;;  %2037 = vst [vmem:[#allocation10_spill] sm:$0xff] %v1532_v16  ;;  %2038 = vst [vmem:[#allocation11_spill] sm:$0xff] %v1535_v17  ;;  %v1553_v22 = vadd.f32 %v439_v5, %v1451_v2 }
  0xad   : > { %2032 = vst [vmem:[#allocation5_spill] sm:$0xff] %v1477_v32  ;;  %2039 = vst [vmem:[#allocation12_spill] sm:$0xff] %v1538_v57  ;;  %v1556_v25 = vmul.f32 %v1421_v53, %v378_v31  ;;  %v1559_v12 = vmul.f32 %v1423_v54, %v378_v31  ;;  %v1562_v63 = vmul.f32 %v1425_v55, %v378_v31 }
  0xae   : > { %2040 = vst [vmem:[#allocation13_spill] sm:$0xff] %v1541_v18  ;;  %2041 = vst [vmem:[#allocation14_spill] sm:$0xff] %v1544_v19  ;;  %v1565_v0 = vmul.f32 %v1427_v56, %v378_v31 }
  0xaf   : > { %2042 = vst [vmem:[#allocation15_spill] sm:$0xff] %v1547_v20  ;;  %2043 = vst [vmem:[#allocation16_spill] sm:$0xff] %v1550_v58 }
  0xb0   : > { %v386_v44 = vpop.permute.xlu1 %385  ;;  %2044 = vst [vmem:[#allocation17_spill] sm:$0xff] %v1553_v22 }
  0xb1   : > { %v253_v6 = vpop.permute.xlu0 %252  ;;  %v1583_v17 = vmul.f32 %v1423_v54, %v386_v44  ;;  %v1586_v16 = vmul.f32 %v1425_v55, %v386_v44 }
  0xb2   : > { %v328_v1 = vmul.f32 %v1413_v49, %v253_v6  ;;  %v329_v26 = vmul.f32 %v1415_v50, %v253_v6  ;;  %v330_v2 = vmul.f32 %v1417_v51, %v253_v6  ;;  %v331_v27 = vmul.f32 %v1419_v52, %v253_v6 }
  0xb3   : > { %v1580_v6 = vmul.f32 %v1421_v53, %v386_v44  ;;  %2046 = vst [vmem:[#allocation19_spill] sm:$0xff] %v1583_v17  ;;  %2047 = vst [vmem:[#allocation20_spill] sm:$0xff] %v1586_v16 }
  0xb4   : > { %v460_v22 = vadd.f32 %v428_v30, %v328_v1  ;;  %v461_v58 = vadd.f32 %v429_v33, %v329_v26  ;;  %v462_v20 = vadd.f32 %v430_v34, %v330_v2  ;;  %v463_v19 = vadd.f32 %v431_v35, %v331_v27 }
  0xb5   : > { %v494_v23 = vpop.permute.xlu1 %493  ;;  %v258_v24 = vpop.permute.xlu0 %257  ;;  %2045 = vst [vmem:[#allocation18_spill] sm:$0xff] %v1580_v6 }
  0xb6   : > { %v332_v28 = vmul.f32 %v1413_v49, %v258_v24  ;;  %v333_v29 = vmul.f32 %v1415_v50, %v258_v24  ;;  %v334_v48 = vmul.f32 %v1417_v51, %v258_v24  ;;  %v335_v3 = vmul.f32 %v1419_v52, %v258_v24 }
  0xb7   : > { %v560_v4 = vmul.f32 %v1433_v59, %v494_v23  ;;  %v561_v31 = vmul.f32 %v1435_v60, %v494_v23  ;;  %v562_v5 = vmul.f32 %v1437_v61, %v494_v23  ;;  %v563_v32 = vmul.f32 %v1439_v62, %v494_v23 }
  0xb8   : > { %v1589_v24 = vmul.f32 %v1427_v56, %v386_v44  ;;  %v464_v47 = vadd.f32 %v432_v7, %v332_v28  ;;  %v465_v23 = vadd.f32 %v433_v8, %v333_v29  ;;  %v466_v46 = vadd.f32 %v434_v9, %v334_v48 }
  0xb9   : > { %v502_v18 = vpop.permute.xlu1 %501  ;;  %v273_v57 = vpop.permute.xlu0 %272  ;;  %v467_v21 = vadd.f32 %v435_v10, %v335_v3  ;;  %v592_v54 = vadd.f32 %v560_v4, %v460_v22  ;;  %v593_v17 = vadd.f32 %v561_v31, %v461_v58  ;;  %v594_v45 = vadd.f32 %v562_v5, %v462_v20 }
  0xba   : > { %v595_v55 = vadd.f32 %v563_v32, %v463_v19  ;;  %v1593_v16 = vmul.f32 %v1433_v59, %v502_v18  ;;  %v1596_v56 = vmul.f32 %v1435_v60, %v502_v18  ;;  %v1599_v30 = vmul.f32 %v1437_v61, %v502_v18 }
  0xbb   : > { %v1602_v33 = vmul.f32 %v1439_v62, %v502_v18  ;;  %v344_v34 = vmul.f32 %v1413_v49, %v273_v57  ;;  %v345_v35 = vmul.f32 %v1415_v50, %v273_v57  ;;  %v346_v44 = vmul.f32 %v1417_v51, %v273_v57 }
  0xbc   : > { %v347_v32 = vmul.f32 %v1419_v52, %v273_v57  ;;  %v596_v7 = vadd.f32 %v564_v13, %v464_v47  ;;  %v597_v8 = vadd.f32 %v565_v14, %v465_v23  ;;  %v598_v9 = vadd.f32 %v566_v11, %v466_v46 }
  0xbd   : > { %v506_v53 = vpop.permute.xlu1 %505  ;;  %v283_v6 = vpop.permute.xlu0 %282  ;;  %v599_v10 = vadd.f32 %v567_v15, %v467_v21  ;;  %v1627_v11 = vadd.f32 %v1556_v25, %v344_v34  ;;  %v1630_v15 = vadd.f32 %v1559_v12, %v345_v35  ;;  %v1633_v27 = vadd.f32 %v1562_v63, %v346_v44 }
  0xbe   : > { %v572_v19 = vmul.f32 %v1433_v59, %v506_v53  ;;  %v573_v20 = vmul.f32 %v1435_v60, %v506_v53  ;;  %v574_v18 = vmul.f32 %v1437_v61, %v506_v53  ;;  %v575_v58 = vmul.f32 %v1439_v62, %v506_v53 }
  0xbf   : > { %v1636_v28 = vadd.f32 %v1565_v0, %v347_v32  ;;  %v352_v5 = vmul.f32 %v1413_v49, %v283_v6  ;;  %v354_v23 = vmul.f32 %v1417_v51, %v283_v6  ;;  %v355_v53 = vmul.f32 %v1419_v52, %v283_v6  ;;  %v2048_v32 = vld [vmem:[#allocation6_spill] sm:$0xff] }
  0xc0   : > { %v604_v25 = vadd.f32 %v572_v19, %v1487_v36  ;;  %v605_v12 = vadd.f32 %v573_v20, %v1489_v37  ;;  %v606_v63 = vadd.f32 %v574_v18, %v1491_v38  ;;  %v607_v0 = vadd.f32 %v575_v58, %v1493_v39  ;;  %v2049_v20 = vld [vmem:[#allocation7_spill] sm:$0xff] }
  0xc1   : > { %v514_v22 = vpop.permute.xlu1 %513  ;;  %v635_v1 = vpop.permute.xlu0 %634 }
  0xc2   : > { %v580_v26 = vmul.f32 %v1433_v59, %v514_v22  ;;  %v581_v57 = vmul.f32 %v1435_v60, %v514_v22  ;;  %v582_v2 = vmul.f32 %v1437_v61, %v514_v22  ;;  %v583_v47 = vmul.f32 %v1439_v62, %v514_v22 }
  0xc3   : > { %v1618_v46 = vadd.f32 %v635_v1, %v592_v54  ;;  %v1620_v21 = vadd.f32 %v635_v1, %v593_v17  ;;  %v1622_v13 = vadd.f32 %v635_v1, %v594_v45  ;;  %v1624_v14 = vadd.f32 %v635_v1, %v595_v55 }
  0xc4   : > { %v612_v29 = vadd.f32 %v580_v26, %v1495_v40  ;;  %v613_v48 = vadd.f32 %v581_v57, %v1497_v41  ;;  %v614_v3 = vadd.f32 %v582_v2, %v1499_v42  ;;  %v615_v4 = vadd.f32 %v583_v47, %v1501_v43  ;;  %v2053_v26 = vld [vmem:[#allocation15_spill] sm:$0xff]  ;;  %v2054_v2 = vld [vmem:[#allocation16_spill] sm:$0xff] }
  0xc5   : > { %704 = vst [vmem:[%s1638_s6] sm:$0xff] %v1618_v46  ;;  %705 = vst [vmem:[%s1638_s6 + $0x8] sm:$0xff] %v1620_v21  ;;  %v522_v45 = vpop.permute.xlu1 %521  ;;  %v650_v17 = vpop.permute.xlu0 %649  ;;  %v353_v43 = vmul.f32 %v1415_v50, %v283_v6  ;;  %v601_v57 = vadd.f32 %v1596_v56, %v2053_v26  ;;  %v602_v47 = vadd.f32 %v1599_v30, %v2054_v2 }
  0xc6   : > { %706 = vst [vmem:[%s1638_s6 + $0x10] sm:$0xff] %v1622_v13  ;;  %707 = vst [vmem:[%s1638_s6 + $0x18] sm:$0xff] %v1624_v14  ;;  %v1656_v31 = vadd.f32 %v650_v17, %v604_v25  ;;  %v1658_v36 = vadd.f32 %v650_v17, %v605_v12  ;;  %v1660_v37 = vadd.f32 %v650_v17, %v606_v63 }
  0xc7   : > { %v1662_v38 = vadd.f32 %v650_v17, %v607_v0  ;;  %v588_v39 = vmul.f32 %v1433_v59, %v522_v45  ;;  %v589_v40 = vmul.f32 %v1435_v60, %v522_v45  ;;  %v590_v41 = vmul.f32 %v1437_v61, %v522_v45 }
  0xc8   : > { %v591_v42 = vmul.f32 %v1439_v62, %v522_v45  ;;  %716 = vst [vmem:[%s1638_s6 + $0x60] sm:$0xff] %v1656_v31  ;;  %717 = vst [vmem:[%s1638_s6 + $0x68] sm:$0xff] %v1658_v36  ;;  %v2055_v45 = vld [vmem:[#allocation17_spill] sm:$0xff] }
  0xc9   : > { %718 = vst [vmem:[%s1638_s6 + $0x70] sm:$0xff] %v1660_v37  ;;  %719 = vst [vmem:[%s1638_s6 + $0x78] sm:$0xff] %v1662_v38  ;;  %v660_v54 = vpop.permute.xlu0 %659  ;;  %v620_v19 = vadd.f32 %v588_v39, %v2048_v32  ;;  %v621_v18 = vadd.f32 %v589_v40, %v2049_v20  ;;  %v603_v17 = vadd.f32 %v1602_v33, %v2055_v45  ;;  %v2058_v40 = vld [vmem:[#allocation12_spill] sm:$0xff]  ;;  %v2063_v20 = vld [vmem:[#allocation5_spill] sm:$0xff] }
  0xca   : > { %v1680_v49 = vadd.f32 %v660_v54, %v612_v29  ;;  %v1682_v50 = vadd.f32 %v660_v54, %v613_v48  ;;  %v1684_v51 = vadd.f32 %v660_v54, %v614_v3  ;;  %v1686_v52 = vadd.f32 %v660_v54, %v615_v4  ;;  %v640_v6 = vpop.permute.xlu1 %639  ;;  %v2056_v48 = vld [vmem:[#allocation10_spill] sm:$0xff]  ;;  %v2057_v4 = vld [vmem:[#allocation11_spill] sm:$0xff] }
  0xcb   : > { %v1688_v55 = vadd.f32 %v640_v6, %v596_v7  ;;  %v1690_v34 = vadd.f32 %v640_v6, %v597_v8  ;;  %v1692_v35 = vadd.f32 %v640_v6, %v598_v9  ;;  %v1694_v44 = vadd.f32 %v640_v6, %v599_v10  ;;  %v2050_v7 = vld [vmem:[#allocation8_spill] sm:$0xff]  ;;  %v2051_v8 = vld [vmem:[#allocation9_spill] sm:$0xff]  ;;  %v2052_v10 = vld [vmem:[#allocation14_spill] sm:$0xff] }
  0xcc   : > { %724 = vst [vmem:[%s1638_s6 + $0xa0] sm:$0xff] %v1680_v49  ;;  %725 = vst [vmem:[%s1638_s6 + $0xa8] sm:$0xff] %v1682_v50  ;;  %v622_v58 = vadd.f32 %v590_v41, %v2050_v7  ;;  %v623_v22 = vadd.f32 %v591_v42, %v2051_v8  ;;  %v600_v1 = vadd.f32 %v1593_v16, %v2052_v10  ;;  %v2059_v42 = vld [vmem:[#allocation13_spill] sm:$0xff] }
  0xcd   : > { %726 = vst [vmem:[%s1638_s6 + $0xb0] sm:$0xff] %v1684_v51  ;;  %727 = vst [vmem:[%s1638_s6 + $0xb8] sm:$0xff] %v1686_v52  ;;  %v670_v9 = vpop.permute.xlu0 %669  ;;  %v608_v3 = vadd.f32 %v2056_v48, %v1627_v11  ;;  %v609_v39 = vadd.f32 %v2057_v4, %v1630_v15  ;;  %v610_v41 = vadd.f32 %v2058_v40, %v1633_v27  ;;  %v2060_v11 = vld [vmem:[#allocation18_spill] sm:$0xff]  ;;  %v2061_v15 = vld [vmem:[#allocation19_spill] sm:$0xff] }
  0xce   : > { %708 = vst [vmem:[%s1638_s6 + $0x20] sm:$0xff] %v1688_v55  ;;  %709 = vst [vmem:[%s1638_s6 + $0x28] sm:$0xff] %v1690_v34  ;;  %v1724_v25 = vadd.f32 %v670_v9, %v620_v19  ;;  %v1726_v12 = vadd.f32 %v670_v9, %v621_v18  ;;  %v1728_v63 = vadd.f32 %v670_v9, %v622_v58  ;;  %v645_v16 = vpop.permute.xlu1 %644  ;;  %v2062_v27 = vld [vmem:[#allocation20_spill] sm:$0xff] }
  0xcf   : > { %710 = vst [vmem:[%s1638_s6 + $0x30] sm:$0xff] %v1692_v35  ;;  %711 = vst [vmem:[%s1638_s6 + $0x38] sm:$0xff] %v1694_v44  ;;  %v1730_v0 = vadd.f32 %v670_v9, %v623_v22  ;;  %v1732_v56 = vadd.f32 %v645_v16, %v600_v1  ;;  %v1734_v29 = vadd.f32 %v645_v16, %v601_v57 }
  0xd0   : > { %v1736_v30 = vadd.f32 %v645_v16, %v602_v47  ;;  %v1738_v33 = vadd.f32 %v645_v16, %v603_v17  ;;  %732 = vst [vmem:[%s1638_s6 + $0xe0] sm:$0xff] %v1724_v25  ;;  %733 = vst [vmem:[%s1638_s6 + $0xe8] sm:$0xff] %v1726_v12  ;;  %v611_v54 = vadd.f32 %v2059_v42, %v1636_v28 }
  0xd1   : > { %734 = vst [vmem:[%s1638_s6 + $0xf0] sm:$0xff] %v1728_v63  ;;  %735 = vst [vmem:[%s1638_s6 + $0xf8] sm:$0xff] %v1730_v0  ;;  %v484_v6 = vadd.f32 %v2060_v11, %v352_v5  ;;  %v485_v32 = vadd.f32 %v2061_v15, %v353_v43  ;;  %v486_v19 = vadd.f32 %v2062_v27, %v354_v23 }
  0xd2   : > { %712 = vst [vmem:[%s1638_s6 + $0x40] sm:$0xff] %v1732_v56  ;;  %713 = vst [vmem:[%s1638_s6 + $0x48] sm:$0xff] %v1734_v29  ;;  %v487_v28 = vadd.f32 %v1589_v24, %v355_v53  ;;  %v584_v18 = vmul.f32 %v1433_v59, %v2063_v20  ;;  %v585_v7 = vmul.f32 %v1435_v60, %v2063_v20  ;;  %v655_v5 = vpop.permute.xlu1 %654 }
  0xd3   : > { %714 = vst [vmem:[%s1638_s6 + $0x50] sm:$0xff] %v1736_v30  ;;  %715 = vst [vmem:[%s1638_s6 + $0x58] sm:$0xff] %v1738_v33  ;;  %v586_v58 = vmul.f32 %v1437_v61, %v2063_v20  ;;  %v587_v8 = vmul.f32 %v1439_v62, %v2063_v20  ;;  %v1776_v22 = vadd.f32 %v655_v5, %v608_v3 }
  0xd4   : > { %v1778_v43 = vadd.f32 %v655_v5, %v609_v39  ;;  %v1780_v23 = vadd.f32 %v655_v5, %v610_v41  ;;  %v1782_v24 = vadd.f32 %v655_v5, %v611_v54  ;;  %v616_v59 = vadd.f32 %v584_v18, %v484_v6 }
  0xd5   : > { %720 = vst [vmem:[%s1638_s6 + $0x80] sm:$0xff] %v1776_v22  ;;  %v617_v60 = vadd.f32 %v585_v7, %v485_v32  ;;  %v618_v61 = vadd.f32 %v586_v58, %v486_v19  ;;  %v619_v62 = vadd.f32 %v587_v8, %v487_v28 }
  0xd6   : > { %721 = vst [vmem:[%s1638_s6 + $0x88] sm:$0xff] %v1778_v43  ;;  %722 = vst [vmem:[%s1638_s6 + $0x90] sm:$0xff] %v1780_v23  ;;  %v665_v53 = vpop.permute.xlu1 %664  ;;  %739 = sbr.rel (%p1053_p0) target bundleno = 224 (0xe0), region = 36 }
  0xd7   : > { %723 = vst [vmem:[%s1638_s6 + $0x98] sm:$0xff] %v1782_v24  ;;  %v1792_v9 = vadd.f32 %v665_v53, %v616_v59  ;;  %v1794_v10 = vadd.f32 %v665_v53, %v617_v60  ;;  %v1796_v1 = vadd.f32 %v665_v53, %v618_v61  ;;  %v1798_v26 = vadd.f32 %v665_v53, %v619_v62 }
  0xd9   : > { %728 = vst [vmem:[%s1638_s6 + $0xc0] sm:$0xff] %v1792_v9  ;;  %729 = vst [vmem:[%s1638_s6 + $0xc8] sm:$0xff] %v1794_v10 }
  0xda   : > { %730 = vst [vmem:[%s1638_s6 + $0xd0] sm:$0xff] %v1796_v1  ;;  %731 = vst [vmem:[%s1638_s6 + $0xd8] sm:$0xff] %v1798_v26 }
  0xdb   : > { %vm740_vm0 = vcmask 15360   ;;  %v1243_v57 = vmov 0.0  }
  0xdc   : > { %741 = vst.msk [vmem:[%s1367_s9] sm:$0xff] %vm740_vm0, %v1243_v57  ;;  %742 = vst.msk [vmem:[%s1367_s9 + $0x8] sm:$0xff] %vm740_vm0, %v1243_v57 }
  0xdd   : > { %743 = vst.msk [vmem:[%s1367_s9 + $0x10] sm:$0xff] %vm740_vm0, %v1243_v57  ;;  %744 = vst.msk [vmem:[%s1367_s9 + $0x18] sm:$0xff] %vm740_vm0, %v1243_v57 }
  0xde   : > { %745 = vst.msk [vmem:[%s1367_s9 + $0x20] sm:$0xff] %vm740_vm0, %v1243_v57  ;;  %746 = vst.msk [vmem:[%s1367_s9 + $0x28] sm:$0xff] %vm740_vm0, %v1243_v57 }
  0xdf   : > { %747 = vst.msk [vmem:[%s1367_s9 + $0x30] sm:$0xff] %vm740_vm0, %v1243_v57  ;;  %748 = vst.msk [vmem:[%s1367_s9 + $0x38] sm:$0xff] %vm740_vm0, %v1243_v57 }
  0xe0 PF: > { %v767_v2 = vadd.f32 %v1734_v29, %v1732_v56  ;;  %v757_v47 = vadd.f32 %v1620_v21, %v1618_v46  ;;  %v772_v45 = vadd.f32 %v1658_v36, %v1656_v31  ;;  %v762_v17 = vadd.f32 %v1690_v34, %v1688_v55  ;;  %s1056_s18 = sshll.u32 %s1226_s19, 6  ;;  %s932_s12 = sshll.u32 %s1638_s6, 4  ;;  %s1921_s12 = int_to_ptr.vmem [resolvable:$true] %s932_s12 }
  0xe1   : > { %v782_v16 = vadd.f32 %v1682_v50, %v1680_v49  ;;  %v777_v48 = vadd.f32 %v1778_v43, %v1776_v22  ;;  %v792_v54 = vadd.f32 %v1726_v12, %v1724_v25  ;;  %v787_v32 = vadd.f32 %v1794_v10, %v1792_v9  ;;  %s929_s8 = sadd.s32 %s1056_s18, %s1403_s10  ;;  %s1925_s27 = scalar_lea.sflag [#allocation3], %s214_s24 }
  0xe2   : > { %v768_v3 = vadd.f32 %v767_v2, %v1736_v30  ;;  %v758_v4 = vadd.f32 %v757_v47, %v1622_v13  ;;  %v773_v39 = vadd.f32 %v772_v45, %v1660_v37  ;;  %v763_v40 = vadd.f32 %v762_v17, %v1692_v35  ;;  %s1057_s11 = sshll.u32 %s929_s8, 7  ;;  %s1146_s30 = scalar_lea.vmem %s1921_s12, 4096 }
  0xe3   : > { %v783_v6 = vadd.f32 %v782_v16, %v1684_v51  ;;  %v778_v15 = vadd.f32 %v777_v48, %v1780_v23  ;;  %v826_v19 = vmul.f32 %v1688_v55, %v1688_v55  ;;  %v827_v28 = vmul.f32 %v1690_v34, %v1690_v34  ;;  %s1919_s23 = scalar_lea.hbm %s2027_s3, %s1057_s11  ;;  %p1147_p1 = scmp.ne.s32.totalorder %s1921_s12, %s1146_s30 }
  0xe4   : > { %v769_v41 = vadd.f32 %v768_v3, %v1738_v33  ;;  %v759_v42 = vadd.f32 %v758_v4, %v1624_v14  ;;  %v774_v11 = vadd.f32 %v773_v39, %v1662_v38  ;;  %v764_v27 = vadd.f32 %v763_v40, %v1694_v44  ;;  %s1244_s19 = smov [#allocation2]  }
  0xe5   : > { %v828_v20 = vmul.f32 %v1692_v35, %v1692_v35  ;;  %v822_v18 = vmul.f32 %v1618_v46, %v1618_v46  ;;  %v823_v7 = vmul.f32 %v1620_v21, %v1620_v21  ;;  %v859_v58 = vadd.f32 %v827_v28, %v826_v19  ;;  %p1148_p2 = pnand %p1147_p1, %p1324_p3  ;;  %s1150_s10 = sshll.u32 %s1244_s19, 4  ;;  %s1151_s10 = int_to_ptr.vmem [resolvable:$false] %s1150_s10 }
  0xe6   : > { %770 = vadd.xlane.f32.xlu1 %v769_v41  ;;  %760 = vadd.xlane.f32.xlu0 %v759_v42  ;;  %v824_v8 = vmul.f32 %v1622_v13, %v1622_v13  ;;  %v834_v5 = vmul.f32 %v1656_v31, %v1656_v31  ;;  %v835_v55 = vmul.f32 %v1658_v36, %v1658_v36  ;;  %s1152_s5 = scalar_lea.vmem %s1151_s10, 8192  ;;  %p1153_p5 = scmp.lt.s32.totalorder %s1921_s12, %s1151_s10 }
  0xe7   : > { %v793_v34 = vadd.f32 %v792_v54, %v1728_v63  ;;  %v788_v35 = vadd.f32 %v787_v32, %v1796_v1  ;;  %v854_v59 = vadd.f32 %v823_v7, %v822_v18  ;;  %v830_v46 = vmul.f32 %v1732_v56, %v1732_v56  ;;  %p1149_p4 = pneg %p1148_p2  ;;  %p1154_p6 = scmp.lt.s32.totalorder %s1152_s5, %s1146_s30 }
  0xe8   : > { %v784_v21 = vadd.f32 %v783_v6, %v1686_v52  ;;  %v779_v13 = vadd.f32 %v778_v15, %v1782_v24  ;;  %v831_v31 = vmul.f32 %v1734_v29, %v1734_v29  ;;  %v829_v36 = vmul.f32 %v1694_v44, %v1694_v44 }
  0xe9   : > { %v860_v60 = vadd.f32 %v859_v58, %v828_v20  ;;  %v825_v61 = vmul.f32 %v1624_v14, %v1624_v14  ;;  %v836_v62 = vmul.f32 %v1660_v37, %v1660_v37  ;;  %v855_v56 = vadd.f32 %v854_v59, %v824_v8  ;;  %p1155_p7 = por %p1154_p6, %p1153_p5 }
  0xea   : > { %775 = vadd.xlane.f32.xlu1 %v774_v11  ;;  %765 = vadd.xlane.f32.xlu0 %v764_v27  ;;  %v869_v53 = vadd.f32 %v835_v55, %v834_v5  ;;  %v832_v57 = vmul.f32 %v1736_v30, %v1736_v30  ;;  %v864_v2 = vadd.f32 %v831_v31, %v830_v46 }
  0xeb   : > { %v842_v47 = vmul.f32 %v1680_v49, %v1680_v49  ;;  %v843_v29 = vmul.f32 %v1682_v50, %v1682_v50  ;;  %v794_v44 = vadd.f32 %v793_v34, %v1730_v0  ;;  %v789_v14 = vadd.f32 %v788_v35, %v1798_v26  ;;  %p1156_p9 = pnand %p1155_p7, %p1149_p4 }
  0xec   : > { %v838_v37 = vmul.f32 %v1776_v22, %v1776_v22  ;;  %v861_v45 = vadd.f32 %v860_v60, %v829_v36  ;;  %v837_v30 = vmul.f32 %v1662_v38, %v1662_v38  ;;  %v833_v17 = vmul.f32 %v1738_v33, %v1738_v33 }
  0xed   : > { %v839_v49 = vmul.f32 %v1778_v43, %v1778_v43  ;;  %v856_v50 = vadd.f32 %v855_v56, %v825_v61  ;;  %v870_v16 = vadd.f32 %v869_v53, %v836_v62  ;;  %v865_v48 = vadd.f32 %v864_v2, %v832_v57 }
  0xee   : > { %785 = vadd.xlane.f32.xlu1 %v784_v21  ;;  %780 = vadd.xlane.f32.xlu0 %v779_v13  ;;  %v844_v3 = vmul.f32 %v1684_v51, %v1684_v51  ;;  %v879_v4 = vadd.f32 %v843_v29, %v842_v47  ;;  %v840_v22 = vmul.f32 %v1780_v23, %v1780_v23 }
  0xef   : > { %v850_v39 = vmul.f32 %v1724_v25, %v1724_v25  ;;  %v851_v38 = vmul.f32 %v1726_v12, %v1726_v12  ;;  %v874_v33 = vadd.f32 %v839_v49, %v838_v37  ;;  %v846_v43 = vmul.f32 %v1792_v9, %v1792_v9 }
  0xf0   : > { %v847_v40 = vmul.f32 %v1794_v10, %v1794_v10  ;;  %v871_v51 = vadd.f32 %v870_v16, %v837_v30  ;;  %v845_v41 = vmul.f32 %v1686_v52, %v1686_v52  ;;  %v841_v23 = vmul.f32 %v1782_v24, %v1782_v24 }
  0xf1   : > { %v866_v25 = vadd.f32 %v865_v48, %v833_v17  ;;  %v880_v42 = vadd.f32 %v879_v4, %v844_v3  ;;  %v852_v12 = vmul.f32 %v1728_v63, %v1728_v63  ;;  %v889_v54 = vadd.f32 %v851_v38, %v850_v39 }
  0xf2   : > { %795 = vadd.xlane.f32.xlu1 %v794_v44  ;;  %790 = vadd.xlane.f32.xlu0 %v789_v14  ;;  %v875_v11 = vadd.f32 %v874_v33, %v840_v22  ;;  %v848_v9 = vmul.f32 %v1796_v1, %v1796_v1  ;;  %v884_v10 = vadd.f32 %v847_v40, %v846_v43 }
  0xf3   : > { %v881_v6 = vadd.f32 %v880_v42, %v845_v41  ;;  %v853_v52 = vmul.f32 %v1730_v0, %v1730_v0  ;;  %v849_v24 = vmul.f32 %v1798_v26, %v1798_v26  ;;  %v890_v15 = vadd.f32 %v889_v54, %v852_v12 }
  0xf4   : > { %v876_v63 = vadd.f32 %v875_v11, %v841_v23  ;;  %v885_v32 = vadd.f32 %v884_v10, %v848_v9 }
  0xf5   : > { %v891_v1 = vadd.f32 %v890_v15, %v853_v52 }
  0xf6   : > { %862 = vadd.xlane.f32.xlu1 %v861_v45  ;;  %857 = vadd.xlane.f32.xlu0 %v856_v50  ;;  %v886_v27 = vadd.f32 %v885_v32, %v849_v24 }
  0xfa   : > { %872 = vadd.xlane.f32.xlu1 %v871_v51  ;;  %867 = vadd.xlane.f32.xlu0 %v866_v25 }
  0xfe   : > { %882 = vadd.xlane.f32.xlu1 %v881_v6  ;;  %877 = vadd.xlane.f32.xlu0 %v876_v63 }
 0x102   : > { %892 = vadd.xlane.f32.xlu1 %v891_v1  ;;  %887 = vadd.xlane.f32.xlu0 %v886_v27 }
 0x103   : > { %1159 = shalt.err (!%p1156_p9)
}
 0x104   : > { %s1160_s24 = scalar_lea.hbm %s1919_s23, 4096  ;;  %s1164_s8 = scalar_lea.hbm %s2027_s3, 16384 }
 0x105   : > { %p1161_p10 = scmp.ne.s32.totalorder %s1919_s23, %s1160_s24  ;;  %p1165_p13 = scmp.lt.s32.totalorder %s1919_s23, %s2027_s3 }
 0x106   : > { %p1166_p0 = scmp.lt.s32.totalorder %s1164_s8, %s1160_s24 }
 0x107   : > { %p1162_p11 = pnand %p1161_p10, %p1324_p3 }
 0x108   : > { %p1167_p1 = por %p1166_p0, %p1165_p13 }
 0x109   : > { %p1163_p12 = pneg %p1162_p11 }
 0x10b   : > { %p1168_p2 = pnand %p1167_p1, %p1163_p12 }
 0x10d   : > { %1171 = shalt.err (!%p1168_p2)
}
 0x10e   : > { %s1245_s14 = smov 512   ;;  %s1246_s30 = smov 1024   ;;  %v751_v0 = vld [vmem:[%s1367_s9 + $0x10] sm:$0xff]  ;;  %v749_v26 = vld [vmem:[%s1367_s9] sm:$0xff]  ;;  %vm805_vm1 = vcmask 7168   ;;  %v752_v7 = vld [vmem:[%s1367_s9 + $0x18] sm:$0xff] }
 0x10f   : > { %s1247_s19 = smov 32   ;;  %v750_v58 = vld [vmem:[%s1367_s9 + $0x8] sm:$0xff]  ;;  %v753_v59 = vld [vmem:[%s1367_s9 + $0x20] sm:$0xff]  ;;  %v756_v36 = vld [vmem:[%s1367_s9 + $0x38] sm:$0xff]  ;;  %vm902_vm2 = vcmask 15368  }
 0x110   : > { %1061 = dma.vmem_to_hbm [thread:$0]  (%p1324_p3), %s1921_s12, 4096, %s1919_s23, %s1925_s27, %s1245_s14, %s1246_s30, %s1247_s19  }
 0x111   : > { %v754_v35 = vld [vmem:[%s1367_s9 + $0x28] sm:$0xff]  ;;  %v755_v60 = vld [vmem:[%s1367_s9 + $0x30] sm:$0xff] }
 0x16f   : > { %v771_v19 = vpop.xlane.xlu1 %770  ;;  %v761_v28 = vpop.xlane.xlu0 %760 }
 0x170   : > { %v799_v20 = vadd.f32 %v771_v19, %v751_v0  ;;  %v797_v18 = vadd.f32 %v761_v28, %v749_v26 }
 0x172   : > { %808 = vst.msk [vmem:[%s1367_s9 + $0x10] sm:$0xff] %vm805_vm1, %v799_v20  ;;  %806 = vst.msk [vmem:[%s1367_s9] sm:$0xff] %vm805_vm1, %v797_v18 }
 0x173   : > { %v776_v8 = vpop.xlane.xlu1 %775  ;;  %v766_v5 = vpop.xlane.xlu0 %765 }
 0x174   : > { %v800_v55 = vadd.f32 %v776_v8, %v752_v7  ;;  %v798_v34 = vadd.f32 %v766_v5, %v750_v58 }
 0x176   : > { %809 = vst.msk [vmem:[%s1367_s9 + $0x18] sm:$0xff] %vm805_vm1, %v800_v55  ;;  %807 = vst.msk [vmem:[%s1367_s9 + $0x8] sm:$0xff] %vm805_vm1, %v798_v34 }
 0x177   : > { %v786_v46 = vpop.xlane.xlu1 %785  ;;  %v781_v21 = vpop.xlane.xlu0 %780 }
 0x178   : > { %v802_v13 = vadd.f32 %v786_v46, %v754_v35  ;;  %v801_v31 = vadd.f32 %v781_v21, %v753_v59 }
 0x179   : > { %v814_v29 = vld [vmem:[%s1367_s9] sm:$0xff]  ;;  %v816_v17 = vld [vmem:[%s1367_s9 + $0x10] sm:$0xff] }
 0x17a   : > { %811 = vst.msk [vmem:[%s1367_s9 + $0x28] sm:$0xff] %vm805_vm1, %v802_v13  ;;  %810 = vst.msk [vmem:[%s1367_s9 + $0x20] sm:$0xff] %vm805_vm1, %v801_v31 }
 0x17b   : > { %v796_v61 = vpop.xlane.xlu1 %795  ;;  %v791_v62 = vpop.xlane.xlu0 %790 }
 0x17c   : > { %v804_v56 = vadd.f32 %v796_v61, %v756_v36  ;;  %v803_v53 = vadd.f32 %v791_v62, %v755_v60 }
 0x17d   : > { %v815_v2 = vld [vmem:[%s1367_s9 + $0x8] sm:$0xff]  ;;  %v817_v45 = vld [vmem:[%s1367_s9 + $0x18] sm:$0xff] }
 0x17e   : > { %813 = vst.msk [vmem:[%s1367_s9 + $0x38] sm:$0xff] %vm805_vm1, %v804_v56  ;;  %812 = vst.msk [vmem:[%s1367_s9 + $0x30] sm:$0xff] %vm805_vm1, %v803_v53 }
 0x17f   : > { %v863_v57 = vpop.xlane.xlu1 %862  ;;  %v858_v47 = vpop.xlane.xlu0 %857 }
 0x180   : > { %v895_v44 = vadd.f32 %v863_v57, %v815_v2  ;;  %v894_v14 = vadd.f32 %v858_v47, %v814_v29 }
 0x181   : > { %v819_v48 = vld [vmem:[%s1367_s9 + $0x28] sm:$0xff]  ;;  %v818_v4 = vld [vmem:[%s1367_s9 + $0x20] sm:$0xff] }
 0x182   : > { %904 = vst.msk [vmem:[%s1367_s9 + $0x8] sm:$0xff] %vm902_vm2, %v895_v44  ;;  %903 = vst.msk [vmem:[%s1367_s9] sm:$0xff] %vm902_vm2, %v894_v14 }
 0x183   : > { %v873_v37 = vpop.xlane.xlu1 %872  ;;  %v868_v30 = vpop.xlane.xlu0 %867 }
 0x184   : > { %v897_v49 = vadd.f32 %v873_v37, %v817_v45  ;;  %v896_v50 = vadd.f32 %v868_v30, %v816_v17 }
 0x185   : > { %v821_v33 = vld [vmem:[%s1367_s9 + $0x38] sm:$0xff]  ;;  %v820_v40 = vld [vmem:[%s1367_s9 + $0x30] sm:$0xff] }
 0x186   : > { %906 = vst.msk [vmem:[%s1367_s9 + $0x18] sm:$0xff] %vm902_vm2, %v897_v49  ;;  %905 = vst.msk [vmem:[%s1367_s9 + $0x10] sm:$0xff] %vm902_vm2, %v896_v50 }
 0x187   : > { %v883_v16 = vpop.xlane.xlu1 %882  ;;  %v878_v3 = vpop.xlane.xlu0 %877 }
 0x188   : > { %v899_v22 = vadd.f32 %v883_v16, %v819_v48  ;;  %v898_v39 = vadd.f32 %v878_v3, %v818_v4 }
 0x18a   : > { %908 = vst.msk [vmem:[%s1367_s9 + $0x28] sm:$0xff] %vm902_vm2, %v899_v22  ;;  %907 = vst.msk [vmem:[%s1367_s9 + $0x20] sm:$0xff] %vm902_vm2, %v898_v39 }
 0x18b   : > { %v893_v38 = vpop.xlane.xlu1 %892  ;;  %v888_v43 = vpop.xlane.xlu0 %887 }
 0x18c   : > { %v901_v51 = vadd.f32 %v893_v38, %v821_v33  ;;  %v900_v41 = vadd.f32 %v888_v43, %v820_v40 }
 0x18e   : > { %910 = vst.msk [vmem:[%s1367_s9 + $0x38] sm:$0xff] %vm902_vm2, %v901_v51  ;;  %909 = vst.msk [vmem:[%s1367_s9 + $0x30] sm:$0xff] %vm902_vm2, %v900_v41 }
 0x18f PF: > { %p1067_p3 = scmp.ge.s32.totalorder %s1238_s22, 2  ;;  %s950_s28 = sand.u32 1, %s1210_s15  }
 0x190   : > { %s951_s12 = scalar_lea.sflag [#allocation3], %s950_s28 }
 0x191   : > { %p1064_p4 = pnand %p1067_p3, %p1333_p8 }
 0x193   : > { %p1065_p5 = pneg %p1064_p4 }
 0x195   : > { %1205 = dma.done.wait (%p1065_p5), %s951_s12, 4096  }
 0x196   : > { %1207 = vsyncadd (%p1065_p5), %s951_s12, 4294963200  ;;  %s18_s22 = sadd.s32 1, %s1238_s22   ;;  %s2064_s15 = smov %s1214_s16 }
 0x197   : > { %p15_p6 = scmp.ge.s32.totalorder %s18_s22, 6   ;;  %s2065_s16 = smov %s1218_s17 }
 0x198   : > { %s2066_s17 = smov %s1342_s7  ;;  %s2067_s18 = smov %s1230_s20 }
 0x199   : > { %s2068_s19 = smov %s1234_s21  ;;  %s2069_s20 = smov %s2072_s25 }
 0x19a   : > { %s2070_s21 = smov %s2076_s26  ;;  %17 = sbr.rel (!%p15_p6) target bundleno = 5 (0x5), region = 83 }
 0x19f   :  { %964 = vsyncpa [#allocation3], 1 }
 0x1a0   :  { %966 = vsyncpa [#allocation3 + $0x1], 1 }

</bundles_post_ra>
